<compile_context>
chip_gen: v6e
topology: v6e:2x2x1
jax: 0.10.0
libtpu: 0.0.40
codegen_flags: <defaults>
</compile_context>

<pallas_src>
import functools

import jax
import jax.numpy as jnp
from jax.experimental import pallas as pl
from jax.experimental.pallas import tpu as pltpu

_LANE_CANDIDATES = (1024, 512, 256, 128)   # lane-dense last dim, multiple of 128
_MAX_BLOCK_ELEMS = 256 * 1024              # ~1 MiB of f32 per pipeline buffer
_NUM_SPLITS = 2                            # leading "parallel" axis (v7x: 2 TCs)


# ---------------------------------------------------------------------------
# Pass 1: global min / max reduction.
# ---------------------------------------------------------------------------
def _minmax_kernel(x_ref, min_out_ref, max_out_ref, acc_min, acc_max, *,
                   rows, tiles_per_split, mask_tail):
    c = pl.program_id(0)                   # split index ("parallel")
    t = pl.program_id(1)                   # row-tile index within split ("arbitrary")
    block_rows, lanes = x_ref.shape
    acc_rows = acc_min.shape[0]

    @pl.when(t == 0)
    def _init():
        acc_min[...] = jnp.full_like(acc_min, jnp.inf)
        acc_max[...] = jnp.full_like(acc_max, -jnp.inf)

    tile = x_ref[...].astype(jnp.float32)

    if mask_tail:
        # Neutralize rows past the real row count (partial tail tile and the
        # clamped "overhang" tile of the last split).
        base = (c * tiles_per_split + t) * block_rows
        row_ids = base + jax.lax.broadcasted_iota(jnp.int32, (block_rows, 1), 0)
        valid = row_ids < rows             # (block_rows, 1), broadcast over lanes
        tile_min = jnp.where(valid, tile, jnp.inf)
        tile_max = jnp.where(valid, tile, -jnp.inf)
    else:
        tile_min = tile
        tile_max = tile

    if block_rows == acc_rows:
        fold_min, fold_max = tile_min, tile_max
    else:
        # Fold rows into the (8, lanes) accumulator shape: pure elementwise
        # VPU min/max over the leading axis — no cross-lane work in the loop.
        k = block_rows // acc_rows
        fold_min = jnp.min(tile_min.reshape(k, acc_rows, lanes), axis=0)
        fold_max = jnp.max(tile_max.reshape(k, acc_rows, lanes), axis=0)

    acc_min[...] = jnp.minimum(acc_min[...], fold_min)
    acc_max[...] = jnp.maximum(acc_max[...], fold_max)

    @pl.when(t == pl.num_programs(1) - 1)
    def _finalize():
        # Single cross-lane/sublane reduction per split, written to SMEM.
        min_out_ref[0, 0] = jnp.min(acc_min[...])
        max_out_ref[0, 0] = jnp.max(acc_max[...])


# ---------------------------------------------------------------------------
# Pass 2: elementwise rescale, fused as o = x * scale + bias.
# ---------------------------------------------------------------------------
def _rescale_kernel(min_ref, max_ref, x_ref, o_ref, *,
                    eps, min_val, max_val, num_splits):
    x_min = min_ref[0, 0]
    x_max = max_ref[0, 0]
    for s in range(1, num_splits):         # combine per-split partials (static)
        x_min = jnp.minimum(x_min, min_ref[s, 0])
        x_max = jnp.maximum(x_max, max_ref[s, 0])
    scale = (max_val - min_val) / (x_max - x_min + eps)
    bias = min_val - x_min * scale
    x = x_ref[...].astype(jnp.float32)
    o_ref[...] = (x * scale + bias).astype(o_ref.dtype)


# ---------------------------------------------------------------------------
# Wrapper.
# ---------------------------------------------------------------------------
def min_max_scaler(x, min_val=0.0, max_val=1.0, eps=1e-5):
    """Pallas implementation of MinMaxScalerLayer.forward."""
    orig_shape = x.shape
    orig_dtype = x.dtype
    n = x.size
    if n == 0:
        return x

    # ---- lane-dense 2-D layout (rows, lanes) -----------------------------
    lanes = None
    for cand in _LANE_CANDIDATES:
        if n % cand == 0:
            lanes = cand
            break
    flat = x.reshape(-1)
    if lanes is None:
        # Element count not a multiple of 128: pad the flat vector with copies
        # of the first element (min/max-neutral); padded outputs sliced off.
        lanes = 128
        pad = (-n) % lanes
        flat = jnp.concatenate([flat, jnp.broadcast_to(flat[:1], (pad,))])
    padded_n = flat.size
    rows = padded_n // lanes
    x2 = flat.reshape(rows, lanes)

    # ---- block sizing (~1 MiB f32 per buffer, multiple of 8 rows) --------
    cap = max(8, (_MAX_BLOCK_ELEMS // lanes) // 8 * 8)
    block_rows = rows if rows <= cap else cap
    n_tiles = -(-rows // block_rows)

    # ---- pass 1: global min / max ----------------------------------------
    num_splits = _NUM_SPLITS if n_tiles >= _NUM_SPLITS else 1
    tiles_per_split = -(-n_tiles // num_splits)
    coverage = num_splits * tiles_per_split * block_rows
    mask_tail = coverage != rows
    acc_rows = 8 if block_rows % 8 == 0 else block_rows

    if num_splits * tiles_per_split == n_tiles:
        x_index_map = lambda c, t: (c * tiles_per_split + t, 0)
    else:
        # Odd tile count: clamp so the overhang tile of the last split never
        # reads out of bounds; its rows are masked inside the kernel.
        x_index_map = lambda c, t: (
            jnp.minimum(c * tiles_per_split + t, n_tiles - 1), 0)

    mm_kernel = functools.partial(
        _minmax_kernel, rows=rows, tiles_per_split=tiles_per_split,
        mask_tail=mask_tail)

    part_min, part_max = pl.pallas_call(
        mm_kernel,
        out_shape=(
            jax.ShapeDtypeStruct((num_splits, 1), jnp.float32),
            jax.ShapeDtypeStruct((num_splits, 1), jnp.float32),
        ),
        grid=(num_splits, tiles_per_split),
        in_specs=[pl.BlockSpec((block_rows, lanes), x_index_map)],
        out_specs=(
            pl.BlockSpec((1, 1), lambda c, t: (c, 0), memory_space=pltpu.SMEM),
            pl.BlockSpec((1, 1), lambda c, t: (c, 0), memory_space=pltpu.SMEM),
        ),
        scratch_shapes=[
            pltpu.VMEM((acc_rows, lanes), jnp.float32),
            pltpu.VMEM((acc_rows, lanes), jnp.float32),
        ],
        compiler_params=pltpu.CompilerParams(
            dimension_semantics=("parallel", "arbitrary")),
    )(x2)

    # ---- pass 2: fused rescale -------------------------------------------
    rs_kernel = functools.partial(
        _rescale_kernel, eps=float(eps), min_val=float(min_val),
        max_val=float(max_val), num_splits=num_splits)

    out2 = pl.pallas_call(
        rs_kernel,
        out_shape=jax.ShapeDtypeStruct((rows, lanes), orig_dtype),
        grid=(n_tiles,),
        in_specs=[
            pl.BlockSpec((num_splits, 1), lambda i: (0, 0),
                         memory_space=pltpu.SMEM),
            pl.BlockSpec((num_splits, 1), lambda i: (0, 0),
                         memory_space=pltpu.SMEM),
            pl.BlockSpec((block_rows, lanes), lambda i: (i, 0)),
        ],
        out_specs=pl.BlockSpec((block_rows, lanes), lambda i: (i, 0)),
        compiler_params=pltpu.CompilerParams(
            dimension_semantics=("parallel",)),
    )(part_min, part_max, x2)

    out_flat = out2.reshape(-1)
    if padded_n != n:
        out_flat = out_flat[:n]
    return out_flat.reshape(orig_shape)


def _reference(x, min_val=0.0, max_val=1.0, eps=1e-5):
    x_min = jnp.min(x)
    x_max = jnp.max(x)
    x_norm = (x - x_min) / (x_max - x_min + eps)
    return x_norm * (max_val - min_val) + min_val


if __name__ == "__main__":
    key = jax.random.PRNGKey(0)
    k1, k2, k3 = jax.random.split(key, 3)

    # Primary test: NCHW input like the PyTorch module would receive.
    x1 = jax.random.normal(k1, (2, 4, 16, 16), dtype=jnp.float32) * 3.0 + 1.5
    # Larger test: exercises big blocks, the 2-way reduction split, the
    # clamped index map, and masked partial tail tiles.
    x2 = jax.random.normal(k2, (2, 9, 250, 256), dtype=jnp.float32) * 5.0 - 2.0
    # Tiny test: element count not a multiple of 128 (fallback padding path).
    x3 = jax.random.normal(k3, (3, 5, 7), dtype=jnp.float32)

    for xi in (x1, x2, x3):
        out = jax.block_until_ready(min_max_scaler(xi, 0.0, 1.0, 1e-5))
        ref = _reference(xi, 0.0, 1.0, 1e-5)
        assert out.shape == xi.shape and out.dtype == xi.dtype
        assert jnp.allclose(out, ref, atol=1e-5, rtol=1e-5), "mismatch vs reference"

    print("KERNEL_OK")
</pallas_src>

<mosaic_0001>
module attributes {stable_mosaic.version = 11 : i64} {
  func.func @_minmax_kernel(%arg0: i32, %arg1: i32, %arg2: memref<2x1024xf32, #tpu.memory_space<vmem>>, %arg3: memref<1x1xf32, #tpu.memory_space<smem>>, %arg4: memref<1x1xf32, #tpu.memory_space<smem>>, %arg5: memref<2x1024xf32, #tpu.memory_space<vmem>>, %arg6: memref<2x1024xf32, #tpu.memory_space<vmem>>) attributes {dimension_semantics = [#tpu.dimension_semantics<parallel>, #tpu.dimension_semantics<arbitrary>], iteration_bounds = array<i64: 1, 1>, scalar_prefetch = 0 : i64, scratch_operands = 2 : i64, tpu.core_type = #tpu.core_type<tc>, window_params = [{transform_indices = @transform_0, window_bounds = array<i64: 2, 1024>}, {transform_indices = @transform_1, window_bounds = array<i64: 1, 1>}, {transform_indices = @transform_2, window_bounds = array<i64: 1, 1>}]} {
    %c0_i32 = arith.constant 0 : i32
    %0 = arith.cmpi eq, %arg1, %c0_i32 : i32
    %1 = arith.extui %0 : i1 to i32
    %c0_i32_0 = arith.constant 0 : i32
    %2 = arith.cmpi ne, %1, %c0_i32_0 : i32
    scf.if %2 {
      %cst = arith.constant 0x7F800000 : f32
      %13 = vector.broadcast %cst : f32 to vector<2x1024xf32>
      %c0_12 = arith.constant 0 : index
      %c0_13 = arith.constant 0 : index
      %14 = vector.load %arg5[%c0_12, %c0_13] : memref<2x1024xf32, #tpu.memory_space<vmem>>, vector<2x1024xf32>
      tpu.vector_store %arg5[%c0_12, %c0_13], %13 {strides = array<i32>} : memref<2x1024xf32, #tpu.memory_space<vmem>>, vector<2x1024xf32>,
      %cst_14 = arith.constant 0xFF800000 : f32
      %15 = vector.broadcast %cst_14 : f32 to vector<2x1024xf32>
      %c0_15 = arith.constant 0 : index
      %c0_16 = arith.constant 0 : index
      %16 = vector.load %arg6[%c0_15, %c0_16] : memref<2x1024xf32, #tpu.memory_space<vmem>>, vector<2x1024xf32>
      tpu.vector_store %arg6[%c0_15, %c0_16], %15 {strides = array<i32>} : memref<2x1024xf32, #tpu.memory_space<vmem>>, vector<2x1024xf32>,
    } else {
    }
    %c0 = arith.constant 0 : index
    %c0_1 = arith.constant 0 : index
    %3 = vector.load %arg2[%c0, %c0_1] : memref<2x1024xf32, #tpu.memory_space<vmem>>, vector<2x1024xf32>
    %c0_2 = arith.constant 0 : index
    %c0_3 = arith.constant 0 : index
    %4 = vector.load %arg5[%c0_2, %c0_3] : memref<2x1024xf32, #tpu.memory_space<vmem>>, vector<2x1024xf32>
    %5 = arith.minimumf %4, %3 : vector<2x1024xf32>
    %c0_4 = arith.constant 0 : index
    %c0_5 = arith.constant 0 : index
    %6 = vector.load %arg5[%c0_4, %c0_5] : memref<2x1024xf32, #tpu.memory_space<vmem>>, vector<2x1024xf32>
    tpu.vector_store %arg5[%c0_4, %c0_5], %5 {strides = array<i32>} : memref<2x1024xf32, #tpu.memory_space<vmem>>, vector<2x1024xf32>,
    %c0_6 = arith.constant 0 : index
    %c0_7 = arith.constant 0 : index
    %7 = vector.load %arg6[%c0_6, %c0_7] : memref<2x1024xf32, #tpu.memory_space<vmem>>, vector<2x1024xf32>
    %8 = arith.maximumf %7, %3 : vector<2x1024xf32>
    %c0_8 = arith.constant 0 : index
    %c0_9 = arith.constant 0 : index
    %9 = vector.load %arg6[%c0_8, %c0_9] : memref<2x1024xf32, #tpu.memory_space<vmem>>, vector<2x1024xf32>
    tpu.vector_store %arg6[%c0_8, %c0_9], %8 {strides = array<i32>} : memref<2x1024xf32, #tpu.memory_space<vmem>>, vector<2x1024xf32>,
    %c0_i32_10 = arith.constant 0 : i32
    %10 = arith.cmpi eq, %arg1, %c0_i32_10 : i32
    %11 = arith.extui %10 : i1 to i32
    %c0_i32_11 = arith.constant 0 : i32
    %12 = arith.cmpi ne, %11, %c0_i32_11 : i32
    scf.if %12 {
      %c0_12 = arith.constant 0 : index
      %c0_13 = arith.constant 0 : index
      %13 = vector.load %arg5[%c0_12, %c0_13] : memref<2x1024xf32, #tpu.memory_space<vmem>>, vector<2x1024xf32>
      %14 = vector.shape_cast %13 : vector<2x1024xf32> to vector<1x2x1024xf32>
      %cst = arith.constant dense<0x7F800000> : vector<1xf32>
      %15 = vector.multi_reduction <minimumf>, %14, %cst [1, 2] : vector<1x2x1024xf32> to vector<1xf32>
      %16 = vector.shape_cast %15 : vector<1xf32> to vector<1x1x1xf32>
      %17 = vector.extract %16[0, 0, 0] : f32 from vector<1x1x1xf32>
      %c0_14 = arith.constant 0 : index
      %c0_15 = arith.constant 0 : index
      %18 = memref.load %arg3[%c0_14, %c0_15] : memref<1x1xf32, #tpu.memory_space<smem>>
      memref.store %17, %arg3[%c0_14, %c0_15] : memref<1x1xf32, #tpu.memory_space<smem>>
      %c0_16 = arith.constant 0 : index
      %c0_17 = arith.constant 0 : index
      %19 = vector.load %arg6[%c0_16, %c0_17] : memref<2x1024xf32, #tpu.memory_space<vmem>>, vector<2x1024xf32>
      %20 = vector.shape_cast %19 : vector<2x1024xf32> to vector<1x2x1024xf32>
      %cst_18 = arith.constant dense<0xFF800000> : vector<1xf32>
      %21 = vector.multi_reduction <maximumf>, %20, %cst_18 [1, 2] : vector<1x2x1024xf32> to vector<1xf32>
      %22 = vector.shape_cast %21 : vector<1xf32> to vector<1x1x1xf32>
      %23 = vector.extract %22[0, 0, 0] : f32 from vector<1x1x1xf32>
      %c0_19 = arith.constant 0 : index
      %c0_20 = arith.constant 0 : index
      %24 = memref.load %arg4[%c0_19, %c0_20] : memref<1x1xf32, #tpu.memory_space<smem>>
      memref.store %23, %arg4[%c0_19, %c0_20] : memref<1x1xf32, #tpu.memory_space<smem>>
    } else {
    }
    return
  }
  func.func @transform_0(%arg0: i32, %arg1: i32) -> (i32, i32) {
    %c1_i32 = arith.constant 1 : i32
    %0 = arith.muli %arg0, %c1_i32 : i32
    %1 = arith.addi %0, %arg1 : i32
    %c0_i32 = arith.constant 0 : i32
    %c0_i32_0 = arith.constant 0 : i32
    return %1, %c0_i32 : i32, i32
  }
  func.func @transform_1(%arg0: i32, %arg1: i32) -> (i32, i32) {
    %c0_i32 = arith.constant 0 : i32
    %c0_i32_0 = arith.constant 0 : i32
    return %arg0, %c0_i32 : i32, i32
  }
  func.func @transform_2(%arg0: i32, %arg1: i32) -> (i32, i32) {
    %c0_i32 = arith.constant 0 : i32
    %c0_i32_0 = arith.constant 0 : i32
    return %arg0, %c0_i32 : i32, i32
  }
}

</mosaic_0001>

<bundles_post_ra>
// kernel: tpu_custom_call.1
= control target key start
LH: loop header
LB: loop body
LE: loop exit
PB: predicated region body
PF: predicated region fallthrough
CT: control target
= control target key end

     0   :  { %8 = vsyncpa [#allocation5], 0  ;;  %s321_s0 = inlined_call_operand.hbm [shape: f32[2,1024], index: 0, kind: input, shape index: {}]   ;;  %s322_s1 = inlined_call_operand.hbm [shape: f32[1,1], index: 1, kind: output, shape index: {0}]   ;;  %s323_s2 = inlined_call_operand.hbm [shape: f32[1,1], index: 2, kind: output, shape index: {1}]  }
   0x1   :  { %9 = vsyncpa [#allocation6], 0 }
   0x2   :  { %10 = vsyncpa [#allocation9], 0  ;;  %s277_s9 = smov [#allocation4]  }
   0x3   :  { %s21_s10 = sshll.u32 %s277_s9, 4  ;;  %s22_s10 = int_to_ptr.vmem [resolvable:$true] %s21_s10 }
   0x4   :  { %s243_s11 = scalar_lea.vmem %s22_s10, 256  ;;  %p248_p1 = scmp.lt.s32.totalorder %s22_s10, %s22_s10 }
   0x5   :  { %p244_p0 = scmp.ne.s32.totalorder %s22_s10, %s243_s11  ;;  %p249_p2 = scmp.lt.s32.totalorder %s243_s11, %s243_s11 }
   0x7   :  { %p250_p3 = por %p249_p2, %p248_p1 }
   0x9   :  { %p251_p4 = pnand %p250_p3, %p244_p0 }
   0xb   :  { %254 = shalt.err (!%p251_p4)
}
   0xc   :  { %24 = dma.hbm_to_vmem [thread:$0]  %s321_s0, 256, %s22_s10, [#allocation5]  }
   0xd   :  { %271 = dma.done.wait [#allocation5], 256  }
   0xe   :  { %272 = vsyncadd [#allocation5], 4294967040  ;;  %v62_v0 = vlaneseq  ;;  %v278_v1 = vmov 1983009808   ;;  %v37_v6 = vld [vmem:[#allocation4] sm:$0xff]  ;;  %v38_v7 = vld [vmem:[#allocation4 + $0x8] sm:$0xff] }
   0xf   :  { %v60_v2 = vunpack.c.l.s4 %v278_v1  ;;  %vm100_vm0 = vcmask 1041408   ;;  %v58_v8 = vcombine.high %v37_v6, %v37_v6  ;;  %v75_v10 = vcombine.high %v38_v7, %v38_v7  ;;  %s279_s14 = smov [#allocation7]   ;;  %s280_s18 = smov [#allocation8]  }
  0x10   :  { %v63_v3 = vshrl.u32 %v62_v0, 7 }
  0x11   :  { %v61_v4 = vunpack.c.0.s8 %v60_v2 }
  0x13   :  { %v64_v5 = vsub.s32 %v61_v4, %v63_v3 }
  0x15   :  { %v65_v9 = vrot.slane %v37_v6, %v64_v5  ;;  %v82_v11 = vrot.slane %v38_v7, %v64_v5  ;;  %v72_v12 = vrot.slane %v58_v8, %v64_v5  ;;  %v89_v14 = vrot.slane %v75_v10, %v64_v5 }
  0x17   :  { %v73_v13 = vcombine.high %v65_v9, %v65_v9  ;;  %v90_v15 = vcombine.high %v82_v11, %v82_v11  ;;  %v101_v16 = vsel %vm100_vm0, %v65_v9, inf  ;;  %v105_v17 = vsel %vm100_vm0, %v82_v11, inf }
  0x18   :  { %v173_v18 = vsel %vm100_vm0, %v65_v9, -inf  ;;  %v177_v19 = vsel %vm100_vm0, %v82_v11, -inf  ;;  %v74_v20 = vcombine.high %v72_v12, %v72_v12  ;;  %v91_v21 = vcombine.high %v89_v14, %v89_v14 }
  0x19   :  { %v102_v22 = vsel %vm100_vm0, %v73_v13, inf  ;;  %v103_v23 = vsel %vm100_vm0, %v72_v12, inf  ;;  %v106_v24 = vmin.f32 %v101_v16, %v105_v17  ;;  %v107_v25 = vsel %vm100_vm0, %v90_v15, inf }
  0x1a   :  { %v109_v26 = vsel %vm100_vm0, %v89_v14, inf  ;;  %v174_v27 = vsel %vm100_vm0, %v73_v13, -inf  ;;  %v104_v28 = vsel %vm100_vm0, %v74_v20, inf  ;;  %v108_v29 = vmin.f32 %v102_v22, %v107_v25 }
  0x1b   :  { %v110_v30 = vmin.f32 %v103_v23, %v109_v26  ;;  %v111_v31 = vsel %vm100_vm0, %v91_v21, inf  ;;  %v175_v33 = vsel %vm100_vm0, %v72_v12, -inf  ;;  %v176_v34 = vsel %vm100_vm0, %v74_v20, -inf }
  0x1c   :  { %v112_v32 = vmin.f32 %v104_v28, %v111_v31  ;;  %v178_v35 = vmax.f32 %v173_v18, %v177_v19  ;;  %v113_v36 = vmin.f32 %v106_v24, %v108_v29  ;;  %v179_v37 = vsel %vm100_vm0, %v90_v15, -inf }
  0x1d   :  { %v181_v38 = vsel %vm100_vm0, %v89_v14, -inf  ;;  %v183_v39 = vsel %vm100_vm0, %v91_v21, -inf  ;;  %v180_v41 = vmax.f32 %v174_v27, %v179_v37 }
  0x1e   :  { %v114_v40 = vmin.f32 %v110_v30, %v112_v32  ;;  %v182_v42 = vmax.f32 %v175_v33, %v181_v38  ;;  %v184_v43 = vmax.f32 %v176_v34, %v183_v39 }
  0x1f   :  { %v185_v45 = vmax.f32 %v178_v35, %v180_v41 }
  0x20   :  { %v115_v44 = vmin.f32 %v113_v36, %v114_v40  ;;  %v186_v46 = vmax.f32 %v182_v42, %v184_v43 }
  0x22   :  { %116 = vmin.xlane.f32.xlu0 %v115_v44  ;;  %v187_v47 = vmax.f32 %v185_v45, %v186_v46 }
  0x26   :  { %188 = vmax.xlane.f32.xlu0 %v187_v47 }
  0xab   :  { %v117_v48 = vpop.xlane.xlu0 %116 }
  0xac   :  { %v118_v49 = vrot.slane %v117_v48, 4 }
  0xae   :  { %v119_v50 = vmin.f32 %v117_v48, %v118_v49 }
  0xaf   :  { %v189_v51 = vpop.xlane.xlu0 %188 }
  0xb0   :  { %v120_v52 = vrot.slane %v119_v50, 2  ;;  %v190_v53 = vrot.slane %v189_v51, 4 }
  0xb2   :  { %v191_v54 = vmax.f32 %v189_v51, %v190_v53  ;;  %v121_v55 = vmin.f32 %v119_v50, %v120_v52 }
  0xb4   :  { %v192_v56 = vrot.slane %v191_v54, 2  ;;  %v122_v57 = vrot.slane %v121_v55, 1 }
  0xb6   :  { %v193_v58 = vmax.f32 %v191_v54, %v192_v56  ;;  %v123_v59 = vmin.f32 %v121_v55, %v122_v57 }
  0xb8   :  { %225 = vpush %v123_v59  ;;  %v194_v60 = vrot.slane %v193_v58, 1 }
  0xba   :  { %v195_v61 = vmax.f32 %v193_v58, %v194_v60 }
  0xbc   :  { %227 = vpush %v195_v61 }
  0xe9   :  { %s226_s0 = spop %225 }
  0xea   :  { %126 = sst [smem:[#allocation7]] %s226_s0 }
  0xeb   :  { %206 = dma.smem_to_hbm %s279_s14, 16, %s322_s1, [#allocation6]  }
  0xed   :  { %s228_s17 = spop %227 }
  0xee   :  { %198 = sst [smem:[#allocation8]] %s228_s17 }
  0xef   :  { %214 = dma.smem_to_hbm %s280_s18, 16, %s323_s2, [#allocation9]  }
  0xf0   :  { %273 = dma.done.wait [#allocation6], 16  }
  0xf1   :  { %274 = vsyncadd [#allocation6], 4294967280 }
  0xf2   :  { %275 = dma.done.wait [#allocation9], 16  }
  0xf3   :  { %276 = vsyncadd [#allocation9], 4294967280 }
  0xf4   :  { %221 = sfence }
  0xf5   :  { %222 = vsyncpa [#allocation5], 1 }
  0xf6   :  { %223 = vsyncpa [#allocation6], 1 }
  0xf7   :  { %224 = vsyncpa [#allocation9], 1 }

</bundles_post_ra>
